<compile_context>
chip_gen: v7x
topology: tpu7x:2x2x1
jax: 0.10.0
libtpu: 0.0.40
codegen_flags: <defaults>
</compile_context>

<pallas_src>
import functools

import jax
import jax.numpy as jnp
from jax.experimental import pallas as pl
from jax.experimental.pallas import tpu as pltpu


_VMEM_LIMIT = 48 * 1024 * 1024  # explicit scoped-VMEM budget (fits v7x's 64 MiB physical)


def _pick_row_tile(rows, target=256):
    """Row-tile for the parallel (T*B, feat) kernels."""
    if rows <= target:
        return rows
    for r in range(target, 7, -1):
        if rows % r == 0 and r % 8 == 0:
            return r
    return rows  # fallback: single block


def _pick_t_chunk(T, B, H, budget_bytes=4 << 20):
    """Timesteps per grid step so the gx/y chunks stay well under scoped VMEM."""
    bytes_per_t = 4 * B * H * 4 + B * H * 4  # gx chunk + y chunk (f32)
    tc = max(1, min(T, budget_bytes // max(bytes_per_t, 1)))
    while T % tc:
        tc -= 1
    return int(tc)


# ----------------- fused FCEncoder + LayerNorm(x @ Wx) precompute -----------------
def _encoder_gx_kernel(x_ref, w0, b0, w1, b1, w2, b2, wx, extra_ref, lnx_w, lnx_b,
                       gx_ref, *, hidden_size):
    # Encoder MLP: bf16 matmul operands, f32 accumulation / bias / ReLU.
    h = jnp.dot(x_ref[...], w0[...], preferred_element_type=jnp.float32) + b0[...]
    h = jnp.maximum(h, 0.0).astype(jnp.bfloat16)
    h = jnp.dot(h, w1[...], preferred_element_type=jnp.float32) + b1[...]
    h = jnp.maximum(h, 0.0).astype(jnp.bfloat16)
    h = jnp.dot(h, w2[...], preferred_element_type=jnp.float32) + b2[...]
    enc = jnp.maximum(h, 0.0).astype(jnp.bfloat16)                     # (R, enc_dim)

    # Per-gate input projection: enc @ Wx_enc[k] plus the precomputed action/reward/beta
    # contribution (extra), equivalent to x @ Wx for the concatenated x.
    g = [jnp.dot(enc, wx[k], preferred_element_type=jnp.float32) + extra_ref[k]
         for k in range(4)]

    # Joint LayerNorm statistics over the full 4H gate vector.
    inv_4h = 1.0 / (4.0 * hidden_size)
    tot = sum(jnp.sum(gk, axis=-1, keepdims=True) for gk in g)
    tot2 = sum(jnp.sum(gk * gk, axis=-1, keepdims=True) for gk in g)
    mean = tot * inv_4h
    var = tot2 * inv_4h - mean * mean
    rstd = jax.lax.rsqrt(var + 1e-5)
    for k in range(4):
        gx_ref[k] = (g[k] - mean) * rstd * lnx_w[k] + lnx_b[k]


def encoder_gx(x2d, extra, enc_p, lstm_p, row_tile=256):
    rows, obs_dim = x2d.shape
    H = lstm_p["wh"].shape[-1]
    h0d = enc_p["w0"].shape[1]
    h1d = enc_p["w1"].shape[1]
    h2d = enc_p["w2"].shape[1]
    R = _pick_row_tile(rows, row_tile)
    kernel = functools.partial(_encoder_gx_kernel, hidden_size=H)
    w2d = lambda r: (0, 0)
    w3d = lambda r: (0, 0, 0)
    return pl.pallas_call(
        kernel,
        out_shape=jax.ShapeDtypeStruct((4, rows, H), jnp.float32),
        grid_spec=pltpu.PrefetchScalarGridSpec(
            num_scalar_prefetch=0,
            grid=(rows // R,),
            in_specs=[
                pl.BlockSpec((R, obs_dim), lambda r: (r, 0)),        # obs rows
                pl.BlockSpec((obs_dim, h0d), w2d), pl.BlockSpec((1, h0d), w2d),
                pl.BlockSpec((h0d, h1d), w2d), pl.BlockSpec((1, h1d), w2d),
                pl.BlockSpec((h1d, h2d), w2d), pl.BlockSpec((1, h2d), w2d),
                pl.BlockSpec((4, h2d, H), w3d),                      # Wx_enc (gate-major)
                pl.BlockSpec((4, R, H), lambda r: (0, r, 0)),        # action/reward/beta term
                pl.BlockSpec((4, 1, H), w3d),                        # LN(x) weight
                pl.BlockSpec((4, 1, H), w3d),                        # LN(x) bias
            ],
            out_specs=pl.BlockSpec((4, R, H), lambda r: (0, r, 0)),
        ),
        compiler_params=pltpu.CompilerParams(
            dimension_semantics=("parallel",), vmem_limit_bytes=_VMEM_LIMIT),
    )(x2d, enc_p["w0"], enc_p["b0"], enc_p["w1"], enc_p["b1"], enc_p["w2"], enc_p["b2"],
      lstm_p["wx_enc"], extra, lstm_p["lnx_w"], lstm_p["lnx_b"])


# ----------------- LSTM recurrence (LayerNorm gates, gx precomputed) ----------------
def _lstm_kernel(gx_ref, wh_ref, bias_ref, lnh_w_ref, lnh_b_ref, h0_ref, c0_ref,
                 y_ref, h_ref, c_ref, *, hidden_size, t_chunk):
    @pl.when(pl.program_id(0) == 0)
    def _():
        h_ref[...] = h0_ref[...]
        c_ref[...] = c0_ref[...]

    inv_4h = 1.0 / (4.0 * hidden_size)

    def step(lt, carry):
        h = h_ref[...]
        c = c_ref[...]
        # Per-gate recurrent matmuls (gate-major layout; no sub-vreg lane slicing).
        gh = [jnp.dot(h, wh_ref[k], preferred_element_type=jnp.float32) for k in range(4)]
        # Joint LayerNorm statistics over the concatenated 4H gate vector.
        tot = sum(jnp.sum(g, axis=-1, keepdims=True) for g in gh)
        tot2 = sum(jnp.sum(g * g, axis=-1, keepdims=True) for g in gh)
        mean = tot * inv_4h
        var = tot2 * inv_4h - mean * mean
        rstd = jax.lax.rsqrt(var + 1e-5)

        def gate(k):
            ghn = (gh[k] - mean) * rstd * lnh_w_ref[k] + lnh_b_ref[k]
            return gx_ref[k, lt] + ghn + bias_ref[k]

        i = jax.nn.sigmoid(gate(0))
        f = jax.nn.sigmoid(gate(1))
        o = jax.nn.sigmoid(gate(2))
        u = jnp.tanh(gate(3))
        c_new = f * c + i * u
        h_new = o * jnp.tanh(c_new)
        h_ref[...] = h_new            # resident output blocks ARE the recurrent carries
        c_ref[...] = c_new
        y_ref[lt] = h_new
        return carry

    jax.lax.fori_loop(0, t_chunk, step, 0, unroll=t_chunk <= 8)


def lstm_unroll(gx, h0, c0, p):
    # gx: (4, T, B, H) f32 -- precomputed LayerNorm(x @ Wx) in gate-major layout.
    _, T, B, H = gx.shape
    Tc = _pick_t_chunk(T, B, H)
    kernel = functools.partial(_lstm_kernel, hidden_size=H, t_chunk=Tc)
    c2 = lambda c: (0, 0)
    c3 = lambda c: (0, 0, 0)
    y, h_n, c_n = pl.pallas_call(
        kernel,
        out_shape=(jax.ShapeDtypeStruct((T, B, H), jnp.float32),
                   jax.ShapeDtypeStruct((B, H), jnp.float32),
                   jax.ShapeDtypeStruct((B, H), jnp.float32)),
        grid_spec=pltpu.PrefetchScalarGridSpec(
            num_scalar_prefetch=0,
            grid=(T // Tc,),
            in_specs=[
                pl.BlockSpec((4, Tc, B, H), lambda c: (0, c, 0, 0)),   # gx chunk
                pl.BlockSpec((4, H, H), c3),                           # Wh (gate-major)
                pl.BlockSpec((4, 1, H), c3),                           # bias
                pl.BlockSpec((4, 1, H), c3),                           # LN(h) weight
                pl.BlockSpec((4, 1, H), c3),                           # LN(h) bias
                pl.BlockSpec((B, H), c2),                              # h0
                pl.BlockSpec((B, H), c2),                              # c0
            ],
            out_specs=[
                pl.BlockSpec((Tc, B, H), lambda c: (c, 0, 0)),         # y chunk
                pl.BlockSpec((B, H), c2),                              # h_n (resident carry)
                pl.BlockSpec((B, H), c2),                              # c_n (resident carry)
            ],
        ),
        compiler_params=pltpu.CompilerParams(
            dimension_semantics=("arbitrary",), vmem_limit_bytes=_VMEM_LIMIT),
    )(gx, p["wh"], p["bias"], p["lnh_w"], p["lnh_b"], h0, c0)
    return y, h_n, c_n


# ------------------------------- DuelingHead (fused) -------------------------------
def _dueling_head_kernel(x_ref, w1, b1, w2, b2, logit_ref, *, action_dim):
    h = jnp.dot(x_ref[...], w1[...], preferred_element_type=jnp.float32) + b1[...]
    h = jnp.maximum(h, 0.0).astype(jnp.bfloat16)
    out = jnp.dot(h, w2[...], preferred_element_type=jnp.float32) + b2[...]
    a = out[:, :action_dim]
    v = out[:, action_dim:action_dim + 1]
    logit_ref[...] = a - jnp.mean(a, axis=-1, keepdims=True) + v


def dueling_head(x2d, head_p, action_dim, row_tile=256):
    rows, H = x2d.shape
    h1 = head_p["w1"].shape[1]          # 2 * head_hidden
    a1 = head_p["w2"].shape[1]          # action_dim + 1
    R = _pick_row_tile(rows, row_tile)
    kernel = functools.partial(_dueling_head_kernel, action_dim=action_dim)
    w2d = lambda r: (0, 0)
    return pl.pallas_call(
        kernel,
        out_shape=jax.ShapeDtypeStruct((rows, action_dim), jnp.float32),
        grid_spec=pltpu.PrefetchScalarGridSpec(
            num_scalar_prefetch=0,
            grid=(rows // R,),
            in_specs=[
                pl.BlockSpec((R, H), lambda r: (r, 0)),
                pl.BlockSpec((H, h1), w2d), pl.BlockSpec((1, h1), w2d),
                pl.BlockSpec((h1, a1), w2d), pl.BlockSpec((1, a1), w2d),
            ],
            out_specs=pl.BlockSpec((R, action_dim), lambda r: (r, 0)),
        ),
        compiler_params=pltpu.CompilerParams(
            dimension_semantics=("parallel",), vmem_limit_bytes=_VMEM_LIMIT),
    )(x2d, head_p["w1"], head_p["b1"], head_p["w2"], head_p["b2"])


# --------------------------------- parameter init ----------------------------------
def init_params(key, obs_dim, hidden_list, action_shape, env_num):
    H = hidden_list[-1]
    h0d, h1d, h2d = hidden_list
    D_in = h2d + action_shape + 1 + env_num

    def lin_w(k, fi, fo):
        return jax.random.normal(k, (fi, fo), jnp.float32) * (1.0 / jnp.sqrt(fi))

    def lin_b(k, fo):
        return jax.random.normal(k, (1, fo), jnp.float32) * 0.01

    ks = list(jax.random.split(key, 24))
    encoder = {
        "w0": lin_w(ks[0], obs_dim, h0d).astype(jnp.bfloat16), "b0": lin_b(ks[1], h0d),
        "w1": lin_w(ks[2], h0d, h1d).astype(jnp.bfloat16), "b1": lin_b(ks[3], h1d),
        "w2": lin_w(ks[4], h1d, h2d).astype(jnp.bfloat16), "b2": lin_b(ks[5], h2d),
    }
    # Wx stored pre-split by input source and gate-major:
    #   x @ Wx == enc @ wx_enc + wx_act[prev_action] + r * wx_rew + wx_beta[beta]
    sc = 1.0 / jnp.sqrt(D_in)
    lstm = {
        "wx_enc": (jax.random.normal(ks[6], (4, h2d, H), jnp.float32) * sc).astype(jnp.bfloat16),
        "wx_act": jax.random.normal(ks[7], (4, action_shape, H), jnp.float32) * sc,
        "wx_rew": jax.random.normal(ks[8], (4, 1, H), jnp.float32) * sc,
        "wx_beta": jax.random.normal(ks[9], (4, env_num, H), jnp.float32) * sc,
        "wh": jax.random.normal(ks[10], (4, H, H), jnp.float32) * (1.0 / jnp.sqrt(H)),
        "bias": jnp.zeros((4, 1, H), jnp.float32),
        "lnx_w": jnp.ones((4, 1, H), jnp.float32), "lnx_b": jnp.zeros((4, 1, H), jnp.float32),
        "lnh_w": jnp.ones((4, 1, H), jnp.float32), "lnh_b": jnp.zeros((4, 1, H), jnp.float32),
    }
    # Dueling head: layer-1 weights of A/V branches fused column-wise, layer-2 weights
    # fused block-diagonally so one matmul yields [advantage | value].
    wa0, wv0 = lin_w(ks[11], H, H), lin_w(ks[12], H, H)
    ba0, bv0 = lin_b(ks[13], H), lin_b(ks[14], H)
    wa1, wv1 = lin_w(ks[15], H, action_shape), lin_w(ks[16], H, 1)
    ba1, bv1 = lin_b(ks[17], action_shape), lin_b(ks[18], 1)
    w2 = jnp.zeros((2 * H, action_shape + 1), jnp.float32)
    w2 = w2.at[:H, :action_shape].set(wa1).at[H:, action_shape:].set(wv1)
    head = {
        "w1": jnp.concatenate([wa0, wv0], axis=1).astype(jnp.bfloat16),
        "b1": jnp.concatenate([ba0, bv0], axis=1),
        "w2": w2.astype(jnp.bfloat16),
        "b2": jnp.concatenate([ba1, bv1], axis=1),
    }
    return {"encoder": encoder, "lstm": lstm, "head": head}


# ----------------------------------- NGU forward -----------------------------------
def ngu_forward(inputs, params, action_shape, collector_env_num):
    obs = inputs["obs"]                                      # (T, B, obs_dim)
    h0, c0 = inputs["prev_state"]                            # (B, H) each
    prev_action = inputs["prev_action"]                      # (T, B) int32
    prev_reward_extrinsic = inputs["prev_reward_extrinsic"]  # (T, B, K)
    beta = inputs["beta"]                                    # (T, B) int32

    T, B = obs.shape[:2]
    H = h0.shape[-1]
    rows = T * B

    lp = params["lstm"]
    # One-hot / reward / concat glue folded into the input projection as row gathers.
    a_flat = prev_action.reshape(rows)
    beta_flat = beta.reshape(rows)
    r_flat = prev_reward_extrinsic[:, :, 0].reshape(rows)
    extra = (jnp.take(lp["wx_act"], a_flat, axis=1)
             + r_flat[None, :, None] * lp["wx_rew"]
             + jnp.take(lp["wx_beta"], beta_flat, axis=1))   # (4, rows, H) f32

    # parallel_wrapper(encoder) + LayerNorm(x @ Wx), row-parallel.
    obs2d = obs.reshape(rows, obs.shape[-1]).astype(jnp.bfloat16)
    gx = encoder_gx(obs2d, extra, params["encoder"], lp)     # (4, rows, H)
    gx = gx.reshape(4, T, B, H)

    # Serial recurrence: only LN(h @ Wh) + gates + elementwise per step.
    y, h_n, c_n = lstm_unroll(gx, h0, c0, lp)

    # parallel_wrapper(head), row-parallel fused dueling head.
    logit = dueling_head(y.reshape(rows, H).astype(jnp.bfloat16),
                         params["head"], action_shape).reshape(T, B, action_shape)

    return {
        "logit": logit,                 # (T, B, action_shape)
        "next_state": (h_n, c_n),       # ((B, H), (B, H))
        "hidden_state": y,              # (T, B, H)  (single-layer LSTM => per-step h)
    }


# --------------------------------------- main ---------------------------------------
if __name__ == "__main__":
    T, B = 8, 2
    obs_dim = 16
    hidden_list = [32, 32, 32]       # encoder_hidden_size_list (small)
    H = hidden_list[-1]              # head_hidden_size
    action_shape = 4
    collector_env_num = 1

    key = jax.random.PRNGKey(0)
    k_par, k_obs, k_act, k_rew, k_h, k_c = jax.random.split(key, 6)

    params = init_params(k_par, obs_dim, hidden_list, action_shape, collector_env_num)

    inputs = {
        "obs": jax.random.normal(k_obs, (T, B, obs_dim), jnp.float32),
        "prev_action": jax.random.randint(k_act, (T, B), 0, action_shape, jnp.int32),
        "prev_reward_extrinsic": jax.random.normal(k_rew, (T, B, 1), jnp.float32),
        "beta": jnp.zeros((T, B), jnp.int32),
        "prev_state": (jax.random.normal(k_h, (B, H), jnp.float32) * 0.1,
                       jax.random.normal(k_c, (B, H), jnp.float32) * 0.1),
    }

    out = ngu_forward(inputs, params, action_shape, collector_env_num)
    jax.block_until_ready(out)

    assert out["logit"].shape == (T, B, action_shape)
    assert out["hidden_state"].shape == (T, B, H)
    assert out["next_state"][0].shape == (B, H)
    assert bool(jnp.all(jnp.isfinite(out["logit"])))
    print("KERNEL_OK")
</pallas_src>

<mosaic_0001>
module attributes {stable_mosaic.version = 11 : i64} {
  func.func @_encoder_gx_kernel(%arg0: i32, %arg1: memref<16x16xbf16, #tpu.memory_space<vmem>>, %arg2: memref<16x32xbf16, #tpu.memory_space<vmem>>, %arg3: memref<1x32xf32, #tpu.memory_space<vmem>>, %arg4: memref<32x32xbf16, #tpu.memory_space<vmem>>, %arg5: memref<1x32xf32, #tpu.memory_space<vmem>>, %arg6: memref<32x32xbf16, #tpu.memory_space<vmem>>, %arg7: memref<1x32xf32, #tpu.memory_space<vmem>>, %arg8: memref<4x32x32xbf16, #tpu.memory_space<vmem>>, %arg9: memref<4x16x32xf32, #tpu.memory_space<vmem>>, %arg10: memref<4x1x32xf32, #tpu.memory_space<vmem>>, %arg11: memref<4x1x32xf32, #tpu.memory_space<vmem>>, %arg12: memref<4x16x32xf32, #tpu.memory_space<vmem>>) attributes {dimension_semantics = [#tpu.dimension_semantics<parallel>], iteration_bounds = array<i64: 1>, scalar_prefetch = 0 : i64, scratch_operands = 0 : i64, tpu.core_type = #tpu.core_type<tc>, window_params = [{transform_indices = @transform_0, window_bounds = array<i64: 16, 16>}, {pipeline_mode = #tpu.pipeline_mode<synchronous>, transform_indices = @transform_1, window_bounds = array<i64: 16, 32>}, {pipeline_mode = #tpu.pipeline_mode<synchronous>, transform_indices = @transform_2, window_bounds = array<i64: 1, 32>}, {pipeline_mode = #tpu.pipeline_mode<synchronous>, transform_indices = @transform_3, window_bounds = array<i64: 32, 32>}, {pipeline_mode = #tpu.pipeline_mode<synchronous>, transform_indices = @transform_4, window_bounds = array<i64: 1, 32>}, {pipeline_mode = #tpu.pipeline_mode<synchronous>, transform_indices = @transform_5, window_bounds = array<i64: 32, 32>}, {pipeline_mode = #tpu.pipeline_mode<synchronous>, transform_indices = @transform_6, window_bounds = array<i64: 1, 32>}, {pipeline_mode = #tpu.pipeline_mode<synchronous>, transform_indices = @transform_7, window_bounds = array<i64: 4, 32, 32>}, {transform_indices = @transform_8, window_bounds = array<i64: 4, 16, 32>}, {pipeline_mode = #tpu.pipeline_mode<synchronous>, transform_indices = @transform_9, window_bounds = array<i64: 4, 1, 32>}, {pipeline_mode = #tpu.pipeline_mode<synchronous>, transform_indices = @transform_10, window_bounds = array<i64: 4, 1, 32>}, {transform_indices = @transform_11, window_bounds = array<i64: 4, 16, 32>}]} {
    %c0 = arith.constant 0 : index
    %c0_0 = arith.constant 0 : index
    %0 = vector.load %arg1[%c0, %c0_0] : memref<16x16xbf16, #tpu.memory_space<vmem>>, vector<16x16xbf16>
    %c0_1 = arith.constant 0 : index
    %c0_2 = arith.constant 0 : index
    %1 = vector.load %arg2[%c0_1, %c0_2] : memref<16x32xbf16, #tpu.memory_space<vmem>>, vector<16x32xbf16>
    %cst = arith.constant dense<0.000000e+00> : vector<16x32xf32>
    %2 = tpu.matmul %0, %1, %cst {dimension_numbers = #tpu.dot_dimension_numbers<[1], [0], [0], [1], [0, 0, 1, 1], [], []>} : vector<16x16xbf16>, vector<16x32xbf16>, vector<16x32xf32> -> vector<16x32xf32>
    %c0_3 = arith.constant 0 : index
    %c0_4 = arith.constant 0 : index
    %3 = vector.load %arg3[%c0_3, %c0_4] : memref<1x32xf32, #tpu.memory_space<vmem>>, vector<1x32xf32>
    %4 = vector.broadcast %3 : vector<1x32xf32> to vector<16x32xf32>
    %5 = arith.addf %2, %4 : vector<16x32xf32>
    %cst_5 = arith.constant 0.000000e+00 : f32
    %6 = vector.broadcast %cst_5 : f32 to vector<16x32xf32>
    %7 = arith.maximumf %5, %6 : vector<16x32xf32>
    %8 = arith.truncf %7 : vector<16x32xf32> to vector<16x32xbf16>
    %c0_6 = arith.constant 0 : index
    %c0_7 = arith.constant 0 : index
    %9 = vector.load %arg4[%c0_6, %c0_7] : memref<32x32xbf16, #tpu.memory_space<vmem>>, vector<32x32xbf16>
    %cst_8 = arith.constant dense<0.000000e+00> : vector<16x32xf32>
    %10 = tpu.matmul %8, %9, %cst_8 {dimension_numbers = #tpu.dot_dimension_numbers<[1], [0], [0], [1], [0, 0, 1, 1], [], []>} : vector<16x32xbf16>, vector<32x32xbf16>, vector<16x32xf32> -> vector<16x32xf32>
    %c0_9 = arith.constant 0 : index
    %c0_10 = arith.constant 0 : index
    %11 = vector.load %arg5[%c0_9, %c0_10] : memref<1x32xf32, #tpu.memory_space<vmem>>, vector<1x32xf32>
    %12 = vector.broadcast %11 : vector<1x32xf32> to vector<16x32xf32>
    %13 = arith.addf %10, %12 : vector<16x32xf32>
    %cst_11 = arith.constant 0.000000e+00 : f32
    %14 = vector.broadcast %cst_11 : f32 to vector<16x32xf32>
    %15 = arith.maximumf %13, %14 : vector<16x32xf32>
    %16 = arith.truncf %15 : vector<16x32xf32> to vector<16x32xbf16>
    %c0_12 = arith.constant 0 : index
    %c0_13 = arith.constant 0 : index
    %17 = vector.load %arg6[%c0_12, %c0_13] : memref<32x32xbf16, #tpu.memory_space<vmem>>, vector<32x32xbf16>
    %cst_14 = arith.constant dense<0.000000e+00> : vector<16x32xf32>
    %18 = tpu.matmul %16, %17, %cst_14 {dimension_numbers = #tpu.dot_dimension_numbers<[1], [0], [0], [1], [0, 0, 1, 1], [], []>} : vector<16x32xbf16>, vector<32x32xbf16>, vector<16x32xf32> -> vector<16x32xf32>
    %c0_15 = arith.constant 0 : index
    %c0_16 = arith.constant 0 : index
    %19 = vector.load %arg7[%c0_15, %c0_16] : memref<1x32xf32, #tpu.memory_space<vmem>>, vector<1x32xf32>
    %20 = vector.broadcast %19 : vector<1x32xf32> to vector<16x32xf32>
    %21 = arith.addf %18, %20 : vector<16x32xf32>
    %cst_17 = arith.constant 0.000000e+00 : f32
    %22 = vector.broadcast %cst_17 : f32 to vector<16x32xf32>
    %23 = arith.maximumf %21, %22 : vector<16x32xf32>
    %24 = arith.truncf %23 : vector<16x32xf32> to vector<16x32xbf16>
    %c0_18 = arith.constant 0 : index
    %c0_19 = arith.constant 0 : index
    %c0_20 = arith.constant 0 : index
    %25 = vector.load %arg8[%c0_18, %c0_19, %c0_20] : memref<4x32x32xbf16, #tpu.memory_space<vmem>>, vector<1x32x32xbf16>
    %26 = vector.shape_cast %25 : vector<1x32x32xbf16> to vector<32x32xbf16>
    %cst_21 = arith.constant dense<0.000000e+00> : vector<16x32xf32>
    %27 = tpu.matmul %24, %26, %cst_21 {dimension_numbers = #tpu.dot_dimension_numbers<[1], [0], [0], [1], [0, 0, 1, 1], [], []>} : vector<16x32xbf16>, vector<32x32xbf16>, vector<16x32xf32> -> vector<16x32xf32>
    %c0_22 = arith.constant 0 : index
    %c0_23 = arith.constant 0 : index
    %c0_24 = arith.constant 0 : index
    %28 = vector.load %arg9[%c0_22, %c0_23, %c0_24] : memref<4x16x32xf32, #tpu.memory_space<vmem>>, vector<1x16x32xf32>
    %29 = vector.shape_cast %28 : vector<1x16x32xf32> to vector<16x32xf32>
    %30 = arith.addf %27, %29 : vector<16x32xf32>
    %c1 = arith.constant 1 : index
    %c0_25 = arith.constant 0 : index
    %c0_26 = arith.constant 0 : index
    %31 = vector.load %arg8[%c1, %c0_25, %c0_26] : memref<4x32x32xbf16, #tpu.memory_space<vmem>>, vector<1x32x32xbf16>
    %32 = vector.shape_cast %31 : vector<1x32x32xbf16> to vector<32x32xbf16>
    %cst_27 = arith.constant dense<0.000000e+00> : vector<16x32xf32>
    %33 = tpu.matmul %24, %32, %cst_27 {dimension_numbers = #tpu.dot_dimension_numbers<[1], [0], [0], [1], [0, 0, 1, 1], [], []>} : vector<16x32xbf16>, vector<32x32xbf16>, vector<16x32xf32> -> vector<16x32xf32>
    %c1_28 = arith.constant 1 : index
    %c0_29 = arith.constant 0 : index
    %c0_30 = arith.constant 0 : index
    %34 = vector.load %arg9[%c1_28, %c0_29, %c0_30] : memref<4x16x32xf32, #tpu.memory_space<vmem>>, vector<1x16x32xf32>
    %35 = vector.shape_cast %34 : vector<1x16x32xf32> to vector<16x32xf32>
    %36 = arith.addf %33, %35 : vector<16x32xf32>
    %c2 = arith.constant 2 : index
    %c0_31 = arith.constant 0 : index
    %c0_32 = arith.constant 0 : index
    %37 = vector.load %arg8[%c2, %c0_31, %c0_32] : memref<4x32x32xbf16, #tpu.memory_space<vmem>>, vector<1x32x32xbf16>
    %38 = vector.shape_cast %37 : vector<1x32x32xbf16> to vector<32x32xbf16>
    %cst_33 = arith.constant dense<0.000000e+00> : vector<16x32xf32>
    %39 = tpu.matmul %24, %38, %cst_33 {dimension_numbers = #tpu.dot_dimension_numbers<[1], [0], [0], [1], [0, 0, 1, 1], [], []>} : vector<16x32xbf16>, vector<32x32xbf16>, vector<16x32xf32> -> vector<16x32xf32>
    %c2_34 = arith.constant 2 : index
    %c0_35 = arith.constant 0 : index
    %c0_36 = arith.constant 0 : index
    %40 = vector.load %arg9[%c2_34, %c0_35, %c0_36] : memref<4x16x32xf32, #tpu.memory_space<vmem>>, vector<1x16x32xf32>
    %41 = vector.shape_cast %40 : vector<1x16x32xf32> to vector<16x32xf32>
    %42 = arith.addf %39, %41 : vector<16x32xf32>
    %c3 = arith.constant 3 : index
    %c0_37 = arith.constant 0 : index
    %c0_38 = arith.constant 0 : index
    %43 = vector.load %arg8[%c3, %c0_37, %c0_38] : memref<4x32x32xbf16, #tpu.memory_space<vmem>>, vector<1x32x32xbf16>
    %44 = vector.shape_cast %43 : vector<1x32x32xbf16> to vector<32x32xbf16>
    %cst_39 = arith.constant dense<0.000000e+00> : vector<16x32xf32>
    %45 = tpu.matmul %24, %44, %cst_39 {dimension_numbers = #tpu.dot_dimension_numbers<[1], [0], [0], [1], [0, 0, 1, 1], [], []>} : vector<16x32xbf16>, vector<32x32xbf16>, vector<16x32xf32> -> vector<16x32xf32>
    %c3_40 = arith.constant 3 : index
    %c0_41 = arith.constant 0 : index
    %c0_42 = arith.constant 0 : index
    %46 = vector.load %arg9[%c3_40, %c0_41, %c0_42] : memref<4x16x32xf32, #tpu.memory_space<vmem>>, vector<1x16x32xf32>
    %47 = vector.shape_cast %46 : vector<1x16x32xf32> to vector<16x32xf32>
    %48 = arith.addf %45, %47 : vector<16x32xf32>
    %cst_43 = arith.constant dense<0.000000e+00> : vector<16xf32>
    %49 = vector.multi_reduction <add>, %30, %cst_43 [1] : vector<16x32xf32> to vector<16xf32>
    %50 = vector.shape_cast %49 : vector<16xf32> to vector<16x1xf32>
    %cst_44 = arith.constant 0.000000e+00 : f32
    %51 = vector.broadcast %cst_44 : f32 to vector<16x1xf32>
    %52 = arith.addf %51, %50 : vector<16x1xf32>
    %cst_45 = arith.constant dense<0.000000e+00> : vector<16xf32>
    %53 = vector.multi_reduction <add>, %36, %cst_45 [1] : vector<16x32xf32> to vector<16xf32>
    %54 = vector.shape_cast %53 : vector<16xf32> to vector<16x1xf32>
    %55 = arith.addf %52, %54 : vector<16x1xf32>
    %cst_46 = arith.constant dense<0.000000e+00> : vector<16xf32>
    %56 = vector.multi_reduction <add>, %42, %cst_46 [1] : vector<16x32xf32> to vector<16xf32>
    %57 = vector.shape_cast %56 : vector<16xf32> to vector<16x1xf32>
    %58 = arith.addf %55, %57 : vector<16x1xf32>
    %cst_47 = arith.constant dense<0.000000e+00> : vector<16xf32>
    %59 = vector.multi_reduction <add>, %48, %cst_47 [1] : vector<16x32xf32> to vector<16xf32>
    %60 = vector.shape_cast %59 : vector<16xf32> to vector<16x1xf32>
    %61 = arith.addf %58, %60 : vector<16x1xf32>
    %62 = arith.mulf %30, %30 : vector<16x32xf32>
    %cst_48 = arith.constant dense<0.000000e+00> : vector<16xf32>
    %63 = vector.multi_reduction <add>, %62, %cst_48 [1] : vector<16x32xf32> to vector<16xf32>
    %64 = vector.shape_cast %63 : vector<16xf32> to vector<16x1xf32>
    %cst_49 = arith.constant 0.000000e+00 : f32
    %65 = vector.broadcast %cst_49 : f32 to vector<16x1xf32>
    %66 = arith.addf %65, %64 : vector<16x1xf32>
    %67 = arith.mulf %36, %36 : vector<16x32xf32>
    %cst_50 = arith.constant dense<0.000000e+00> : vector<16xf32>
    %68 = vector.multi_reduction <add>, %67, %cst_50 [1] : vector<16x32xf32> to vector<16xf32>
    %69 = vector.shape_cast %68 : vector<16xf32> to vector<16x1xf32>
    %70 = arith.addf %66, %69 : vector<16x1xf32>
    %71 = arith.mulf %42, %42 : vector<16x32xf32>
    %cst_51 = arith.constant dense<0.000000e+00> : vector<16xf32>
    %72 = vector.multi_reduction <add>, %71, %cst_51 [1] : vector<16x32xf32> to vector<16xf32>
    %73 = vector.shape_cast %72 : vector<16xf32> to vector<16x1xf32>
    %74 = arith.addf %70, %73 : vector<16x1xf32>
    %75 = arith.mulf %48, %48 : vector<16x32xf32>
    %cst_52 = arith.constant dense<0.000000e+00> : vector<16xf32>
    %76 = vector.multi_reduction <add>, %75, %cst_52 [1] : vector<16x32xf32> to vector<16xf32>
    %77 = vector.shape_cast %76 : vector<16xf32> to vector<16x1xf32>
    %78 = arith.addf %74, %77 : vector<16x1xf32>
    %cst_53 = arith.constant 7.812500e-03 : f32
    %79 = vector.broadcast %cst_53 : f32 to vector<16x1xf32>
    %80 = arith.mulf %61, %79 : vector<16x1xf32>
    %cst_54 = arith.constant 7.812500e-03 : f32
    %81 = vector.broadcast %cst_54 : f32 to vector<16x1xf32>
    %82 = arith.mulf %78, %81 : vector<16x1xf32>
    %83 = arith.mulf %80, %80 : vector<16x1xf32>
    %84 = arith.subf %82, %83 : vector<16x1xf32>
    %cst_55 = arith.constant 9.99999974E-6 : f32
    %85 = vector.broadcast %cst_55 : f32 to vector<16x1xf32>
    %86 = arith.addf %84, %85 : vector<16x1xf32>
    %87 = math.rsqrt %86 : vector<16x1xf32>
    %88 = vector.broadcast %80 : vector<16x1xf32> to vector<16x32xf32>
    %89 = arith.subf %30, %88 : vector<16x32xf32>
    %90 = vector.broadcast %87 : vector<16x1xf32> to vector<16x32xf32>
    %91 = arith.mulf %89, %90 : vector<16x32xf32>
    %c0_56 = arith.constant 0 : index
    %c0_57 = arith.constant 0 : index
    %c0_58 = arith.constant 0 : index
    %92 = vector.load %arg10[%c0_56, %c0_57, %c0_58] : memref<4x1x32xf32, #tpu.memory_space<vmem>>, vector<1x1x32xf32>
    %93 = vector.shape_cast %92 : vector<1x1x32xf32> to vector<1x32xf32>
    %94 = vector.broadcast %93 : vector<1x32xf32> to vector<16x32xf32>
    %95 = arith.mulf %91, %94 : vector<16x32xf32>
    %c0_59 = arith.constant 0 : index
    %c0_60 = arith.constant 0 : index
    %c0_61 = arith.constant 0 : index
    %96 = vector.load %arg11[%c0_59, %c0_60, %c0_61] : memref<4x1x32xf32, #tpu.memory_space<vmem>>, vector<1x1x32xf32>
    %97 = vector.shape_cast %96 : vector<1x1x32xf32> to vector<1x32xf32>
    %98 = vector.broadcast %97 : vector<1x32xf32> to vector<16x32xf32>
    %99 = arith.addf %95, %98 : vector<16x32xf32>
    %c0_62 = arith.constant 0 : index
    %c0_63 = arith.constant 0 : index
    %c0_64 = arith.constant 0 : index
    %100 = vector.load %arg12[%c0_62, %c0_63, %c0_64] : memref<4x16x32xf32, #tpu.memory_space<vmem>>, vector<1x16x32xf32>
    %101 = vector.shape_cast %100 : vector<1x16x32xf32> to vector<16x32xf32>
    %102 = vector.shape_cast %99 : vector<16x32xf32> to vector<1x16x32xf32>
    tpu.vector_store %arg12[%c0_62, %c0_63, %c0_64], %102 {strides = array<i32>} : memref<4x16x32xf32, #tpu.memory_space<vmem>>, vector<1x16x32xf32>,
    %103 = vector.broadcast %80 : vector<16x1xf32> to vector<16x32xf32>
    %104 = arith.subf %36, %103 : vector<16x32xf32>
    %105 = vector.broadcast %87 : vector<16x1xf32> to vector<16x32xf32>
    %106 = arith.mulf %104, %105 : vector<16x32xf32>
    %c1_65 = arith.constant 1 : index
    %c0_66 = arith.constant 0 : index
    %c0_67 = arith.constant 0 : index
    %107 = vector.load %arg10[%c1_65, %c0_66, %c0_67] : memref<4x1x32xf32, #tpu.memory_space<vmem>>, vector<1x1x32xf32>
    %108 = vector.shape_cast %107 : vector<1x1x32xf32> to vector<1x32xf32>
    %109 = vector.broadcast %108 : vector<1x32xf32> to vector<16x32xf32>
    %110 = arith.mulf %106, %109 : vector<16x32xf32>
    %c1_68 = arith.constant 1 : index
    %c0_69 = arith.constant 0 : index
    %c0_70 = arith.constant 0 : index
    %111 = vector.load %arg11[%c1_68, %c0_69, %c0_70] : memref<4x1x32xf32, #tpu.memory_space<vmem>>, vector<1x1x32xf32>
    %112 = vector.shape_cast %111 : vector<1x1x32xf32> to vector<1x32xf32>
    %113 = vector.broadcast %112 : vector<1x32xf32> to vector<16x32xf32>
    %114 = arith.addf %110, %113 : vector<16x32xf32>
    %c1_71 = arith.constant 1 : index
    %c0_72 = arith.constant 0 : index
    %c0_73 = arith.constant 0 : index
    %115 = vector.load %arg12[%c1_71, %c0_72, %c0_73] : memref<4x16x32xf32, #tpu.memory_space<vmem>>, vector<1x16x32xf32>
    %116 = vector.shape_cast %115 : vector<1x16x32xf32> to vector<16x32xf32>
    %117 = vector.shape_cast %114 : vector<16x32xf32> to vector<1x16x32xf32>
    tpu.vector_store %arg12[%c1_71, %c0_72, %c0_73], %117 {strides = array<i32>} : memref<4x16x32xf32, #tpu.memory_space<vmem>>, vector<1x16x32xf32>,
    %118 = vector.broadcast %80 : vector<16x1xf32> to vector<16x32xf32>
    %119 = arith.subf %42, %118 : vector<16x32xf32>
    %120 = vector.broadcast %87 : vector<16x1xf32> to vector<16x32xf32>
    %121 = arith.mulf %119, %120 : vector<16x32xf32>
    %c2_74 = arith.constant 2 : index
    %c0_75 = arith.constant 0 : index
    %c0_76 = arith.constant 0 : index
    %122 = vector.load %arg10[%c2_74, %c0_75, %c0_76] : memref<4x1x32xf32, #tpu.memory_space<vmem>>, vector<1x1x32xf32>
    %123 = vector.shape_cast %122 : vector<1x1x32xf32> to vector<1x32xf32>
    %124 = vector.broadcast %123 : vector<1x32xf32> to vector<16x32xf32>
    %125 = arith.mulf %121, %124 : vector<16x32xf32>
    %c2_77 = arith.constant 2 : index
    %c0_78 = arith.constant 0 : index
    %c0_79 = arith.constant 0 : index
    %126 = vector.load %arg11[%c2_77, %c0_78, %c0_79] : memref<4x1x32xf32, #tpu.memory_space<vmem>>, vector<1x1x32xf32>
    %127 = vector.shape_cast %126 : vector<1x1x32xf32> to vector<1x32xf32>
    %128 = vector.broadcast %127 : vector<1x32xf32> to vector<16x32xf32>
    %129 = arith.addf %125, %128 : vector<16x32xf32>
    %c2_80 = arith.constant 2 : index
    %c0_81 = arith.constant 0 : index
    %c0_82 = arith.constant 0 : index
    %130 = vector.load %arg12[%c2_80, %c0_81, %c0_82] : memref<4x16x32xf32, #tpu.memory_space<vmem>>, vector<1x16x32xf32>
    %131 = vector.shape_cast %130 : vector<1x16x32xf32> to vector<16x32xf32>
    %132 = vector.shape_cast %129 : vector<16x32xf32> to vector<1x16x32xf32>
    tpu.vector_store %arg12[%c2_80, %c0_81, %c0_82], %132 {strides = array<i32>} : memref<4x16x32xf32, #tpu.memory_space<vmem>>, vector<1x16x32xf32>,
    %133 = vector.broadcast %80 : vector<16x1xf32> to vector<16x32xf32>
    %134 = arith.subf %48, %133 : vector<16x32xf32>
    %135 = vector.broadcast %87 : vector<16x1xf32> to vector<16x32xf32>
    %136 = arith.mulf %134, %135 : vector<16x32xf32>
    %c3_83 = arith.constant 3 : index
    %c0_84 = arith.constant 0 : index
    %c0_85 = arith.constant 0 : index
    %137 = vector.load %arg10[%c3_83, %c0_84, %c0_85] : memref<4x1x32xf32, #tpu.memory_space<vmem>>, vector<1x1x32xf32>
    %138 = vector.shape_cast %137 : vector<1x1x32xf32> to vector<1x32xf32>
    %139 = vector.broadcast %138 : vector<1x32xf32> to vector<16x32xf32>
    %140 = arith.mulf %136, %139 : vector<16x32xf32>
    %c3_86 = arith.constant 3 : index
    %c0_87 = arith.constant 0 : index
    %c0_88 = arith.constant 0 : index
    %141 = vector.load %arg11[%c3_86, %c0_87, %c0_88] : memref<4x1x32xf32, #tpu.memory_space<vmem>>, vector<1x1x32xf32>
    %142 = vector.shape_cast %141 : vector<1x1x32xf32> to vector<1x32xf32>
    %143 = vector.broadcast %142 : vector<1x32xf32> to vector<16x32xf32>
    %144 = arith.addf %140, %143 : vector<16x32xf32>
    %c3_89 = arith.constant 3 : index
    %c0_90 = arith.constant 0 : index
    %c0_91 = arith.constant 0 : index
    %145 = vector.load %arg12[%c3_89, %c0_90, %c0_91] : memref<4x16x32xf32, #tpu.memory_space<vmem>>, vector<1x16x32xf32>
    %146 = vector.shape_cast %145 : vector<1x16x32xf32> to vector<16x32xf32>
    %147 = vector.shape_cast %144 : vector<16x32xf32> to vector<1x16x32xf32>
    tpu.vector_store %arg12[%c3_89, %c0_90, %c0_91], %147 {strides = array<i32>} : memref<4x16x32xf32, #tpu.memory_space<vmem>>, vector<1x16x32xf32>,
    return
  }
  func.func @transform_0(%arg0: i32) -> (i32, i32) {
    %c0_i32 = arith.constant 0 : i32
    %c0_i32_0 = arith.constant 0 : i32
    return %arg0, %c0_i32 : i32, i32
  }
  func.func @transform_1(%arg0: i32) -> (i32, i32) {
    %c0_i32 = arith.constant 0 : i32
    %c0_i32_0 = arith.constant 0 : i32
    %c0_i32_1 = arith.constant 0 : i32
    return %c0_i32, %c0_i32_0 : i32, i32
  }
  func.func @transform_2(%arg0: i32) -> (i32, i32) {
    %c0_i32 = arith.constant 0 : i32
    %c0_i32_0 = arith.constant 0 : i32
    %c0_i32_1 = arith.constant 0 : i32
    return %c0_i32, %c0_i32_0 : i32, i32
  }
  func.func @transform_3(%arg0: i32) -> (i32, i32) {
    %c0_i32 = arith.constant 0 : i32
    %c0_i32_0 = arith.constant 0 : i32
    %c0_i32_1 = arith.constant 0 : i32
    return %c0_i32, %c0_i32_0 : i32, i32
  }
  func.func @transform_4(%arg0: i32) -> (i32, i32) {
    %c0_i32 = arith.constant 0 : i32
    %c0_i32_0 = arith.constant 0 : i32
    %c0_i32_1 = arith.constant 0 : i32
    return %c0_i32, %c0_i32_0 : i32, i32
  }
  func.func @transform_5(%arg0: i32) -> (i32, i32) {
    %c0_i32 = arith.constant 0 : i32
    %c0_i32_0 = arith.constant 0 : i32
    %c0_i32_1 = arith.constant 0 : i32
    return %c0_i32, %c0_i32_0 : i32, i32
  }
  func.func @transform_6(%arg0: i32) -> (i32, i32) {
    %c0_i32 = arith.constant 0 : i32
    %c0_i32_0 = arith.constant 0 : i32
    %c0_i32_1 = arith.constant 0 : i32
    return %c0_i32, %c0_i32_0 : i32, i32
  }
  func.func @transform_7(%arg0: i32) -> (i32, i32, i32) {
    %c0_i32 = arith.constant 0 : i32
    %c0_i32_0 = arith.constant 0 : i32
    %c0_i32_1 = arith.constant 0 : i32
    %c0_i32_2 = arith.constant 0 : i32
    return %c0_i32, %c0_i32_0, %c0_i32_1 : i32, i32, i32
  }
  func.func @transform_8(%arg0: i32) -> (i32, i32, i32) {
    %c0_i32 = arith.constant 0 : i32
    %c0_i32_0 = arith.constant 0 : i32
    %c0_i32_1 = arith.constant 0 : i32
    return %c0_i32, %arg0, %c0_i32_0 : i32, i32, i32
  }
  func.func @transform_9(%arg0: i32) -> (i32, i32, i32) {
    %c0_i32 = arith.constant 0 : i32
    %c0_i32_0 = arith.constant 0 : i32
    %c0_i32_1 = arith.constant 0 : i32
    %c0_i32_2 = arith.constant 0 : i32
    return %c0_i32, %c0_i32_0, %c0_i32_1 : i32, i32, i32
  }
  func.func @transform_10(%arg0: i32) -> (i32, i32, i32) {
    %c0_i32 = arith.constant 0 : i32
    %c0_i32_0 = arith.constant 0 : i32
    %c0_i32_1 = arith.constant 0 : i32
    %c0_i32_2 = arith.constant 0 : i32
    return %c0_i32, %c0_i32_0, %c0_i32_1 : i32, i32, i32
  }
  func.func @transform_11(%arg0: i32) -> (i32, i32, i32) {
    %c0_i32 = arith.constant 0 : i32
    %c0_i32_0 = arith.constant 0 : i32
    %c0_i32_1 = arith.constant 0 : i32
    return %c0_i32, %arg0, %c0_i32_0 : i32, i32, i32
  }
}

</mosaic_0001>

<bundles_post_ra>
// kernel: tpu_custom_call.1
= control target key start
LH: loop header
LB: loop body
LE: loop exit
PB: predicated region body
PF: predicated region fallthrough
CT: control target
= control target key end

     0   :  { %16 = vsyncpa [#allocation3], 0  ;;  %s1430_s0 = inlined_call_operand.hbm [shape: bf16[16,16], index: 0, kind: input, shape index: {}]   ;;  %s1431_s1 = inlined_call_operand.hbm [shape: bf16[16,32], index: 1, kind: input, shape index: {}]   ;;  %s1432_s2 = inlined_call_operand.vmem [shape: f32[1,32], index: 2, kind: input, shape index: {}]   ;;  %s1433_s3 = inlined_call_operand.hbm [shape: bf16[32,32], index: 3, kind: input, shape index: {}]   ;;  %s1434_s4 = inlined_call_operand.vmem [shape: f32[1,32], index: 4, kind: input, shape index: {}]   ;;  %s1435_s5 = inlined_call_operand.vmem [shape: bf16[32,32], index: 5, kind: input, shape index: {}]   ;;  %s1436_s6 = inlined_call_operand.hbm [shape: f32[1,32], index: 6, kind: input, shape index: {}]   ;;  %s1437_s7 = inlined_call_operand.hbm [shape: bf16[4,32,32], index: 7, kind: input, shape index: {}]   ;;  %s1438_s8 = inlined_call_operand.hbm [shape: f32[4,16,32], index: 8, kind: input, shape index: {}]   ;;  %s1439_s9 = inlined_call_operand.vmem [shape: f32[4,1,32], index: 9, kind: input, shape index: {}]   ;;  %s1440_s10 = inlined_call_operand.vmem [shape: f32[4,1,32], index: 10, kind: input, shape index: {}]   ;;  %s1441_s11 = inlined_call_operand.hbm [shape: f32[4,16,32], index: 11, kind: output, shape index: {}]  }
   0x1   :  { %17 = vsyncpa [#allocation6], 0 }
   0x2   :  { %18 = vsyncpa [#allocation9], 0 }
   0x3   :  { %19 = vsyncpa [#allocation12], 0 }
   0x4   :  { %20 = vsyncpa [#allocation4], 0  ;;  %s1092_s17 = smov [#allocation5]   ;;  %s1093_s19 = smov [#allocation8]  }
   0x5   :  { %s38_s18 = sshll.u32 %s1092_s17, 4  ;;  %s69_s20 = sshll.u32 %s1093_s19, 4  ;;  %s39_s18 = int_to_ptr.vmem [resolvable:$true] %s38_s18  ;;  %s1165_s20 = int_to_ptr.vmem [resolvable:$true] %s69_s20 }
   0x6   :  { %s928_s23 = scalar_lea.hbm %s1431_s1, 128 }
   0x7   :  { %p929_p0 = scmp.ne.s32.totalorder %s1431_s1, %s928_s23  ;;  %p932_p1 = scmp.lt.u32.totalorder %s928_s23, %s1431_s1 }
   0x9   :  { %p934_p2 = pnand %p932_p1, %p929_p0 }
   0xb   :  { %937 = shalt.err (!%p934_p2)
}
   0xc   :  { %s938_s28 = scalar_lea.vmem %s39_s18, 128  ;;  %p943_p4 = scmp.lt.s32.totalorder %s39_s18, %s39_s18 }
   0xd   :  { %p939_p3 = scmp.ne.s32.totalorder %s39_s18, %s938_s28  ;;  %p944_p5 = scmp.lt.s32.totalorder %s938_s28, %s938_s28 }
   0xf   :  { %p945_p6 = por %p944_p5, %p943_p4 }
  0x11   :  { %p946_p7 = pnand %p945_p6, %p939_p3 }
  0x13   :  { %949 = shalt.err (!%p946_p7)
}
  0x14   :  { %s1094_s29 = smov 64   ;;  %s1095_s30 = smov 4  }
  0x15   :  { %44 = dma.hbm_to_vmem [thread:$0]  %s1431_s1, 128, %s39_s18, [#allocation6], %s1094_s29, %s1094_s29, %s1095_s30  }
  0x16   :  { %s950_s16 = scalar_lea.hbm %s1436_s6, 16 }
  0x17   :  { %p951_p8 = scmp.ne.s32.totalorder %s1436_s6, %s950_s16  ;;  %p954_p9 = scmp.lt.u32.totalorder %s950_s16, %s1436_s6 }
  0x19   :  { %p956_p10 = pnand %p954_p9, %p951_p8 }
  0x1b   :  { %959 = shalt.err (!%p956_p10)
}
  0x1c   :  { %s960_s23 = scalar_lea.vmem %s1165_s20, 16  ;;  %s964_s1 = scalar_lea.vmem %s1165_s20, 32 }
  0x1d   :  { %p961_p11 = scmp.ne.s32.totalorder %s1165_s20, %s960_s23  ;;  %p965_p12 = scmp.lt.s32.totalorder %s1165_s20, %s1165_s20 }
  0x1e   :  { %p966_p13 = scmp.lt.s32.totalorder %s964_s1, %s960_s23 }
  0x20   :  { %p967_p0 = por %p966_p13, %p965_p12 }
  0x22   :  { %p968_p1 = pnand %p967_p0, %p961_p11 }
  0x24   :  { %971 = shalt.err (!%p968_p1)
}
  0x25   :  { %72 = dma.hbm_to_vmem [thread:$0]  %s1436_s6, 16, %s1165_s20, [#allocation9]  }
  0x26   :  { %s1096_s25 = smov [#allocation2]   ;;  %s1097_s27 = smov [#allocation7]  }
  0x27   :  { %s26_s26 = sshll.u32 %s1096_s25, 4  ;;  %s52_s28 = sshll.u32 %s1097_s27, 4  ;;  %s27_s26 = int_to_ptr.vmem [resolvable:$true] %s26_s26  ;;  %s1200_s28 = int_to_ptr.vmem [resolvable:$true] %s52_s28 }
  0x28   :  { %s972_s14 = scalar_lea.hbm %s1430_s0, 128 }
  0x29   :  { %p973_p2 = scmp.ne.s32.totalorder %s1430_s0, %s972_s14  ;;  %p976_p3 = scmp.lt.u32.totalorder %s972_s14, %s1430_s0 }
  0x2b   :  { %p978_p4 = pnand %p976_p3, %p973_p2 }
  0x2d   :  { %981 = shalt.err (!%p978_p4)
}
  0x2e   :  { %s982_s6 = scalar_lea.vmem %s27_s26, 128  ;;  %p987_p6 = scmp.lt.s32.totalorder %s27_s26, %s27_s26 }
  0x2f   :  { %p983_p5 = scmp.ne.s32.totalorder %s27_s26, %s982_s6  ;;  %p988_p7 = scmp.lt.s32.totalorder %s982_s6, %s982_s6 }
  0x31   :  { %p989_p8 = por %p988_p7, %p987_p6 }
  0x33   :  { %p990_p9 = pnand %p989_p8, %p983_p5 }
  0x35   :  { %993 = shalt.err (!%p990_p9)
}
  0x36   :  { %32 = dma.hbm_to_vmem [thread:$0]  %s1430_s0, 128, %s27_s26, [#allocation3], %s1094_s29, %s1094_s29, %s1095_s30  }
  0x37   :  { %s994_s1 = scalar_lea.hbm %s1433_s3, 256 }
  0x38   :  { %p995_p10 = scmp.ne.s32.totalorder %s1433_s3, %s994_s1  ;;  %p998_p11 = scmp.lt.u32.totalorder %s994_s1, %s1433_s3 }
  0x3a   :  { %p1000_p12 = pnand %p998_p11, %p995_p10 }
  0x3c   :  { %1003 = shalt.err (!%p1000_p12)
}
  0x3d   :  { %s1004_s12 = scalar_lea.vmem %s1200_s28, 256  ;;  %p1009_p0 = scmp.lt.s32.totalorder %s1200_s28, %s1200_s28 }
  0x3e   :  { %p1005_p13 = scmp.ne.s32.totalorder %s1200_s28, %s1004_s12  ;;  %p1010_p1 = scmp.lt.s32.totalorder %s1004_s12, %s1004_s12 }
  0x40   :  { %p1011_p2 = por %p1010_p1, %p1009_p0 }
  0x42   :  { %p1012_p3 = pnand %p1011_p2, %p1005_p13 }
  0x44   :  { %1015 = shalt.err (!%p1012_p3)
}
  0x45   :  { %58 = dma.hbm_to_vmem [thread:$0]  %s1433_s3, 256, %s1200_s28, [#allocation6], %s1094_s29, %s1094_s29, %s1095_s30  }
  0x46   :  { %s1098_s13 = smov [#allocation10]   ;;  %s1099_s15 = smov [#allocation11]  }
  0x47   :  { %s78_s14 = sshll.u32 %s1098_s13, 4  ;;  %s90_s16 = sshll.u32 %s1099_s15, 4  ;;  %s79_s14 = int_to_ptr.vmem [resolvable:$true] %s78_s14  ;;  %s1237_s16 = int_to_ptr.vmem [resolvable:$true] %s90_s16 }
  0x48   :  { %s1016_s6 = scalar_lea.hbm %s1437_s7, 1024 }
  0x49   :  { %p1017_p4 = scmp.ne.s32.totalorder %s1437_s7, %s1016_s6  ;;  %p1020_p5 = scmp.lt.u32.totalorder %s1016_s6, %s1437_s7 }
  0x4b   :  { %p1022_p6 = pnand %p1020_p5, %p1017_p4 }
  0x4d   :  { %1025 = shalt.err (!%p1022_p6)
}
  0x4e   :  { %s1026_s3 = scalar_lea.vmem %s79_s14, 1024  ;;  %p1031_p8 = scmp.lt.s32.totalorder %s79_s14, %s79_s14 }
  0x4f   :  { %p1027_p7 = scmp.ne.s32.totalorder %s79_s14, %s1026_s3  ;;  %p1032_p9 = scmp.lt.s32.totalorder %s1026_s3, %s1026_s3 }
  0x51   :  { %p1033_p10 = por %p1032_p9, %p1031_p8 }
  0x53   :  { %p1034_p11 = pnand %p1033_p10, %p1027_p7 }
  0x55   :  { %1037 = shalt.err (!%p1034_p11)
}
  0x56   :  { %84 = dma.hbm_to_vmem [thread:$0]  %s1437_s7, 1024, %s79_s14, [#allocation9], %s1094_s29, %s1094_s29, %s1095_s30  }
  0x57   :  { %s1038_s25 = scalar_lea.hbm %s1438_s8, 1024 }
  0x58   :  { %p1039_p12 = scmp.ne.s32.totalorder %s1438_s8, %s1038_s25  ;;  %p1042_p13 = scmp.lt.u32.totalorder %s1038_s25, %s1438_s8 }
  0x5a   :  { %p1044_p0 = pnand %p1042_p13, %p1039_p12 }
  0x5c   :  { %1047 = shalt.err (!%p1044_p0)
}
  0x5d   :  { %s1048_s13 = scalar_lea.vmem %s1237_s16, 1024  ;;  %p1053_p2 = scmp.lt.s32.totalorder %s1237_s16, %s1237_s16 }
  0x5e   :  { %p1049_p1 = scmp.ne.s32.totalorder %s1237_s16, %s1048_s13  ;;  %p1054_p3 = scmp.lt.s32.totalorder %s1048_s13, %s1048_s13 }
  0x60   :  { %p1055_p4 = por %p1054_p3, %p1053_p2 }
  0x62   :  { %p1056_p5 = pnand %p1055_p4, %p1049_p1 }
  0x64   :  { %1059 = shalt.err (!%p1056_p5)
}
  0x65   :  { %s1100_s7 = smov 128   ;;  %s1101_s29 = smov 8  }
  0x66   :  { %96 = dma.hbm_to_vmem [thread:$0]  %s1438_s8, 1024, %s1237_s16, [#allocation12], %s1100_s7, %s1100_s7, %s1101_s29  }
  0x67   :  { %1082 = dma.done.wait [#allocation3], 128  }
  0x68   :  { %1083 = vsyncadd [#allocation3], 4294967168 }
  0x69   :  { %1084 = dma.done.wait [#allocation6], 384  }
  0x6a   :  { %1085 = vsyncadd [#allocation6], 4294966912 }
  0x6b   :  { %1086 = dma.done.wait [#allocation9], 1040  }
  0x6c   :  { %1087 = vsyncadd [#allocation9], 4294966256 }
  0x6d   :  { %1088 = dma.done.wait [#allocation12], 1024  }
  0x6e   :  { %1089 = vsyncadd [#allocation12], 4294966272  ;;  %v1102_v0 = vmov 0.0   ;;  %vm1103_vm0 = vmmov 0   ;;  %v910_v1 = vld [vmem:[#allocation5] sm:$0xff]   ;;  %v911_v2 = vld [vmem:[#allocation2] sm:$0xff]  }
  0x6f   :  { %843 = vmatprep.subr.bf16.mxu0 %v1102_v0  ;;  %845 = vmatprep.mubr.msk.bf16.mxu0 %vm1103_vm0, %v1102_v0  ;;  %vm142_vm1 = vcmask 130048   ;;  %v912_v3 = vld [vmem:[#allocation7] sm:$0xff]   ;;  %v913_v4 = vld [vmem:[#allocation7 + $0x8] sm:$0xff]   ;;  %vm213_vm2 = vcmask 261120   ;;  %v916_v27 = vld [vmem:[#allocation10] sm:$0xff]   ;;  %s1104_s13 = smov [#allocation13]  }
  0x70   :  { %849 = vmatprep.subr.bf16.mxu1 %v1102_v0  ;;  %853 = vmatprep.mubr.msk.bf16.mxu1 %vm1103_vm0, %v1102_v0  ;;  %v785_v5 = vld [vmem:[%s1432_s2] ss:$0 sm:$0xff]  ;;  %v915_v16 = vld [vmem:[%s1435_s5 + $0x8] sm:$0xff]   ;;  %v793_v31 = vld [vmem:[#allocation8] ss:$0 sm:$0xff]  ;;  %s770_s30 = sshll.u32 %s1104_s13, 4  ;;  %s771_s30 = int_to_ptr.vmem [resolvable:$true] %s770_s30 }
  0x71   :  { %844 = vmatpush3.bf16.msra.mxu0 %v910_v1  ;;  %850 = vmatpush3.bf16.msra.mxu1 %v912_v3  ;;  %v914_v15 = vld [vmem:[%s1435_s5] sm:$0xff]   ;;  %v919_v30 = vld [vmem:[#allocation10 + $0x18] sm:$0xff]   ;;  %v920_v40 = vld [vmem:[#allocation10 + $0x20] sm:$0xff]   ;;  %p1065_p7 = scmp.lt.s32.totalorder %s771_s30, %s771_s30 }
  0x72   :  { %857 = vmatprep.subr.bf16.mxu0 %v1102_v0  ;;  %851 = vmatprep.subr.bf16.mxu1 %v1102_v0  ;;  %v789_v17 = vld [vmem:[%s1434_s4] ss:$0 sm:$0xff]  ;;  %v917_v28 = vld [vmem:[#allocation10 + $0x10] sm:$0xff]   ;;  %v923_v44 = vld [vmem:[#allocation10 + $0x38] sm:$0xff]  }
  0x73   :  { %v918_v29 = vld [vmem:[#allocation10 + $0x8] sm:$0xff]   ;;  %v921_v41 = vld [vmem:[#allocation10 + $0x30] sm:$0xff]   ;;  %v335_v45 = vld [vmem:[#allocation11] sm:$0xff] }
  0x74   :  { %846 = vmatmul.mubr.msk.bf16.vlgmr.msra.gmra.mrb[0].mxu0 %vm142_vm1, %v911_v2  ;;  %v922_v43 = vld [vmem:[#allocation10 + $0x28] sm:$0xff]   ;;  %v399_v46 = vld [vmem:[#allocation11 + $0x10] sm:$0xff]  ;;  %v400_v50 = vld [vmem:[#allocation11 + $0x18] sm:$0xff] }
  0x75   :  { %861 = vmatprep.mubr.msk.bf16.mxu0 %vm1103_vm0, %v1102_v0  ;;  %852 = vmatpush3.bf16.msra.mxu1 %v913_v4  ;;  %v336_v49 = vld [vmem:[#allocation11 + $0x8] sm:$0xff] }
  0x76   :  { %865 = vmatprep.subr.bf16.mxu1 %v1102_v0  ;;  %858 = vmatpush3.bf16.msra.mxu0 %v914_v15  ;;  %v460_v15 = vld [vmem:[#allocation11 + $0x20] sm:$0xff] }
  0x77   :  { %859 = vmatprep.subr.bf16.mxu0 %v1102_v0 }
  0x7a   :  { %860 = vmatpush3.bf16.msra.mxu0 %v915_v16  ;;  %v461_v16 = vld [vmem:[#allocation11 + $0x28] sm:$0xff] }
  0x7b   :  { %873 = vmatprep.subr.bf16.mxu0 %v1102_v0 }
 0x147   :  { %v180_v6 = vpop.f32.mrb[0].mxu0 }
 0x148   :  { %v181_v7 = vadd.f32 %v785_v5, %v180_v6  ;;  %v847_v8 = vpop.f32.mrb[1].mxu0 }
 0x149   :  { %v183_v9 = vpop.f32.mrb[2].mxu0 }
 0x14a   :  { %v184_v10 = vadd.f32 %v785_v5, %v183_v9  ;;  %v848_v11 = vpop.f32.mrb[3].mxu0  ;;  %v187_v12 = vmax.f32 %v181_v7, 0.0 }
 0x14c   :  { %v188_v13 = vmax.f32 %v184_v10, 0.0 }
 0x14e   :  { %v189_v14 = vpack.c.bf16 %v188_v13, %v187_v12 }
 0x150   :  { %854 = vmatmul.mubr.msk.bf16.vlgmr.msra.gmra.mrb[0].mxu1 %vm213_vm2, %v189_v14 }
 0x151   :  { %869 = vmatprep.mubr.msk.bf16.mxu1 %vm1103_vm0, %v1102_v0  ;;  %866 = vmatpush3.bf16.msra.mxu1 %v916_v27 }
 0x152   :  { %867 = vmatprep.subr.bf16.mxu1 %v1102_v0 }
 0x155   :  { %868 = vmatpush3.bf16.msra.mxu1 %v918_v29 }
 0x156   :  { %881 = vmatprep.subr.bf16.mxu1 %v1102_v0 }
 0x223   :  { %v251_v18 = vpop.f32.mrb[0].mxu1 }
 0x224   :  { %v252_v19 = vadd.f32 %v789_v17, %v251_v18  ;;  %v855_v20 = vpop.f32.mrb[1].mxu1 }
 0x225   :  { %v254_v21 = vpop.f32.mrb[2].mxu1 }
 0x226   :  { %v255_v22 = vadd.f32 %v789_v17, %v254_v21  ;;  %v856_v23 = vpop.f32.mrb[3].mxu1  ;;  %v258_v24 = vmax.f32 %v252_v19, 0.0  ;;  %v521_v21 = vld [vmem:[#allocation11 + $0x30] sm:$0xff] }
 0x228   :  { %v259_v25 = vmax.f32 %v255_v22, 0.0  ;;  %v522_v22 = vld [vmem:[#allocation11 + $0x38] sm:$0xff] }
 0x22a   :  { %v260_v26 = vpack.c.bf16 %v259_v25, %v258_v24 }
 0x22c   :  { %862 = vmatmul.mubr.msk.bf16.vlgmr.msra.gmra.mrb[4].mxu0 %vm213_vm2, %v260_v26 }
 0x22d   :  { %877 = vmatprep.mubr.msk.bf16.mxu0 %vm1103_vm0, %v1102_v0  ;;  %874 = vmatpush3.bf16.msra.mxu0 %v917_v28 }
 0x22e   :  { %875 = vmatprep.subr.bf16.mxu0 %v1102_v0 }
 0x231   :  { %876 = vmatpush3.bf16.msra.mxu0 %v919_v30 }
 0x232   :  { %889 = vmatprep.subr.bf16.mxu0 %v1102_v0 }
 0x2ff   :  { %v321_v32 = vpop.f32.mrb[4].mxu0 }
 0x300   :  { %v322_v33 = vadd.f32 %v793_v31, %v321_v32  ;;  %v863_v34 = vpop.f32.mrb[5].mxu0 }
 0x301   :  { %v324_v35 = vpop.f32.mrb[6].mxu0 }
 0x302   :  { %v325_v36 = vadd.f32 %v793_v31, %v324_v35  ;;  %v864_v37 = vpop.f32.mrb[7].mxu0  ;;  %v328_v38 = vmax.f32 %v322_v33, 0.0 }
 0x304   :  { %v329_v39 = vmax.f32 %v325_v36, 0.0 }
 0x306   :  { %v330_v42 = vpack.c.bf16 %v329_v39, %v328_v38 }
 0x308   :  { %870 = vmatmul.mubr.msk.bf16.vlgmr.msra.gmra.mrb[4].mxu1 %vm213_vm2, %v330_v42  ;;  %878 = vmatmul.mubr.msk.bf16.vlgmr.msra.gmra.mrb[8].mxu0 %vm213_vm2, %v330_v42 }
 0x309   :  { %882 = vmatpush3.bf16.msra.mxu1 %v920_v40  ;;  %890 = vmatpush3.bf16.msra.mxu0 %v921_v41 }
 0x30a   :  { %883 = vmatprep.subr.bf16.mxu1 %v1102_v0  ;;  %891 = vmatprep.subr.bf16.mxu0 %v1102_v0 }
 0x30b   :  { %885 = vmatprep.mubr.msk.bf16.mxu1 %vm1103_vm0, %v1102_v0  ;;  %893 = vmatprep.mubr.msk.bf16.mxu0 %vm1103_vm0, %v1102_v0 }
 0x30d   :  { %884 = vmatpush3.bf16.msra.mxu1 %v922_v43  ;;  %892 = vmatpush3.bf16.msra.mxu0 %v923_v44 }
 0x310   :  { %886 = vmatmul.mubr.msk.bf16.vlgmr.msra.gmra.mrb[8].mxu1 %vm213_vm2, %v330_v42  ;;  %894 = vmatmul.mubr.msk.bf16.vlgmr.msra.gmra.mrb[12].mxu0 %vm213_vm2, %v330_v42 }
 0x3db   :  { %v386_v47 = vpop.f32.mrb[4].mxu1  ;;  %v447_v48 = vpop.f32.mrb[8].mxu0 }
 0x3dc   :  { %v1319_v51 = vadd.f32 %v386_v47, %v335_v45  ;;  %v1321_v52 = vadd.f32 %v447_v48, %v399_v46  ;;  %v871_v53 = vpop.f32.mrb[5].mxu1  ;;  %v879_v54 = vpop.f32.mrb[9].mxu0 }
 0x3dd   :  { %v389_v55 = vpop.f32.mrb[6].mxu1  ;;  %v450_v56 = vpop.f32.mrb[10].mxu0 }
 0x3de   :  { %v1323_v57 = vadd.f32 %v389_v55, %v336_v49  ;;  %v1325_v58 = vadd.f32 %v450_v56, %v400_v50  ;;  %v872_v59 = vpop.f32.mrb[7].mxu1  ;;  %v880_v60 = vpop.f32.mrb[11].mxu0  ;;  %v576_v61 = vsel %vm213_vm2, %v1319_v51, 0.0  ;;  %v584_v62 = vsel %vm213_vm2, %v1321_v52, 0.0 }
 0x3df   :  { %577 = vadd.xlane.f32.xlu0 %v576_v61  ;;  %585 = vadd.xlane.f32.xlu1 %v584_v62  ;;  %v608_v1 = vmul.f32 %v1319_v51, %v1319_v51  ;;  %v618_v13 = vmul.f32 %v1321_v52, %v1321_v52 }
 0x3e0   :  { %v579_v63 = vsel %vm213_vm2, %v1323_v57, 0.0  ;;  %v587_v0 = vsel %vm213_vm2, %v1325_v58, 0.0  ;;  %v609_v2 = vmul.f32 %v1323_v57, %v1323_v57  ;;  %v619_v14 = vmul.f32 %v1325_v58, %v1325_v58 }
 0x3e1   :  { %v610_v11 = vsel %vm213_vm2, %v608_v1, 0.0  ;;  %v620_v19 = vsel %vm213_vm2, %v618_v13, 0.0 }
 0x3e2   :  { %v613_v12 = vsel %vm213_vm2, %v609_v2, 0.0  ;;  %v623_v20 = vsel %vm213_vm2, %v619_v14, 0.0 }
 0x3e3   :  { %580 = vadd.xlane.f32.xlu0 %v579_v63  ;;  %v508_v3 = vpop.f32.mrb[8].mxu1  ;;  %588 = vadd.xlane.f32.xlu1 %v587_v0  ;;  %v569_v4 = vpop.f32.mrb[12].mxu0 }
 0x3e4   :  { %v887_v5 = vpop.f32.mrb[9].mxu1  ;;  %v895_v6 = vpop.f32.mrb[13].mxu0  ;;  %v1345_v17 = vadd.f32 %v508_v3, %v460_v15  ;;  %v1351_v23 = vadd.f32 %v569_v4, %v521_v21  ;;  %v809_v21 = vld [vmem:[%s1439_s9] ss:$0 sm:$0xff] }
 0x3e5   :  { %v511_v7 = vpop.f32.mrb[10].mxu1  ;;  %v572_v8 = vpop.f32.mrb[14].mxu0 }
 0x3e6   :  { %v888_v9 = vpop.f32.mrb[11].mxu1  ;;  %v896_v10 = vpop.f32.mrb[15].mxu0  ;;  %v1347_v18 = vadd.f32 %v511_v7, %v461_v16  ;;  %v1353_v24 = vadd.f32 %v572_v8, %v522_v22  ;;  %v592_v25 = vsel %vm213_vm2, %v1345_v17, 0.0  ;;  %v600_v27 = vsel %vm213_vm2, %v1351_v23, 0.0  ;;  %v812_v22 = vld [vmem:[%s1439_s9 + $0x1] ss:$0 sm:$0xff] }
 0x3e7   :  { %611 = vadd.xlane.f32.xlu0 %v610_v11  ;;  %614 = vadd.xlane.f32.xlu1 %v613_v12  ;;  %v628_v29 = vmul.f32 %v1345_v17, %v1345_v17  ;;  %v638_v33 = vmul.f32 %v1351_v23, %v1351_v23 }
 0x3e8   :  { %v595_v26 = vsel %vm213_vm2, %v1347_v18, 0.0  ;;  %v603_v28 = vsel %vm213_vm2, %v1353_v24, 0.0  ;;  %v629_v30 = vmul.f32 %v1347_v18, %v1347_v18  ;;  %v639_v34 = vmul.f32 %v1353_v24, %v1353_v24 }
 0x3e9   :  { %v630_v31 = vsel %vm213_vm2, %v628_v29, 0.0  ;;  %v640_v35 = vsel %vm213_vm2, %v638_v33, 0.0 }
 0x3ea   :  { %v633_v32 = vsel %vm213_vm2, %v629_v30, 0.0  ;;  %v643_v36 = vsel %vm213_vm2, %v639_v34, 0.0  ;;  %v818_v34 = vld [vmem:[%s1440_s10 + $0x2] ss:$0 sm:$0xff] }
 0x3eb   :  { %621 = vadd.xlane.f32.xlu0 %v620_v19  ;;  %624 = vadd.xlane.f32.xlu1 %v623_v20 }
 0x3ef   :  { %593 = vadd.xlane.f32.xlu0 %v592_v25  ;;  %596 = vadd.xlane.f32.xlu1 %v595_v26 }
 0x3f3   :  { %601 = vadd.xlane.f32.xlu0 %v600_v27  ;;  %604 = vadd.xlane.f32.xlu1 %v603_v28 }
 0x3f7   :  { %631 = vadd.xlane.f32.xlu0 %v630_v31  ;;  %634 = vadd.xlane.f32.xlu1 %v633_v32 }
 0x3fb   :  { %641 = vadd.xlane.f32.xlu0 %v640_v35  ;;  %644 = vadd.xlane.f32.xlu1 %v643_v36  ;;  %v822_v36 = vld [vmem:[%s1440_s10 + $0x3] ss:$0 sm:$0xff] }
 0x46c   :  { %v578_v37 = vpop.xlane.xlu0 %577  ;;  %v586_v38 = vpop.xlane.xlu1 %585 }
 0x46d   :  { %v590_v47 = vadd.f32 %v586_v38, %v578_v37 }
 0x470   :  { %v581_v39 = vpop.xlane.xlu0 %580  ;;  %v589_v40 = vpop.xlane.xlu1 %588 }
 0x471   :  { %v591_v48 = vadd.f32 %v589_v40, %v581_v39 }
 0x474   :  { %v612_v41 = vpop.xlane.xlu0 %611  ;;  %v615_v42 = vpop.xlane.xlu1 %614 }
 0x478   :  { %v622_v43 = vpop.xlane.xlu0 %621  ;;  %v625_v44 = vpop.xlane.xlu1 %624 }
 0x479   :  { %v626_v61 = vadd.f32 %v622_v43, %v612_v41  ;;  %v627_v62 = vadd.f32 %v625_v44, %v615_v42 }
 0x47c   :  { %v594_v45 = vpop.xlane.xlu0 %593  ;;  %v597_v46 = vpop.xlane.xlu1 %596 }
 0x47d   :  { %v598_v53 = vadd.f32 %v594_v45, %v590_v47  ;;  %v599_v54 = vadd.f32 %v597_v46, %v591_v48 }
 0x480   :  { %v602_v49 = vpop.xlane.xlu0 %601  ;;  %v605_v50 = vpop.xlane.xlu1 %604 }
 0x481   :  { %v606_v55 = vadd.f32 %v602_v49, %v598_v53  ;;  %v607_v56 = vadd.f32 %v605_v50, %v599_v54 }
 0x483   :  { %v648_v63 = vmul.f32 0.0078125, %v606_v55  ;;  %v649_v0 = vmul.f32 0.0078125, %v607_v56 }
 0x484   :  { %v632_v59 = vpop.xlane.xlu0 %631  ;;  %v635_v60 = vpop.xlane.xlu1 %634 }
 0x485   :  { %v636_v1 = vadd.f32 %v632_v59, %v626_v61  ;;  %v637_v2 = vadd.f32 %v635_v60, %v627_v62  ;;  %v652_v7 = vmul.f32 %v648_v63, %v648_v63  ;;  %v653_v9 = vmul.f32 %v649_v0, %v649_v0 }
 0x486   :  { %v660_v15 = vsub.f32 %v1319_v51, %v648_v63  ;;  %v684_v16 = vsub.f32 %v1321_v52, %v648_v63  ;;  %v711_v19 = vsub.f32 %v1345_v17, %v648_v63  ;;  %v738_v20 = vsub.f32 %v1351_v23, %v648_v63  ;;  %v816_v17 = vld [vmem:[%s1439_s9 + $0x2] ss:$0 sm:$0xff]  ;;  %v820_v23 = vld [vmem:[%s1439_s9 + $0x3] ss:$0 sm:$0xff] }
 0x487   :  { %v661_v26 = vsub.f32 %v1323_v57, %v649_v0  ;;  %v685_v27 = vsub.f32 %v1325_v58, %v649_v0  ;;  %v712_v51 = vsub.f32 %v1347_v18, %v649_v0  ;;  %v739_v52 = vsub.f32 %v1353_v24, %v649_v0  ;;  %v810_v57 = vld [vmem:[%s1440_s10] ss:$0 sm:$0xff]  ;;  %v814_v24 = vld [vmem:[%s1440_s10 + $0x1] ss:$0 sm:$0xff]  ;;  %s1060_s10 = scalar_lea.vmem %s771_s30, 1024 }
 0x488   :  { %v642_v3 = vpop.xlane.xlu0 %641  ;;  %v645_v4 = vpop.xlane.xlu1 %644  ;;  %p1061_p6 = scmp.ne.s32.totalorder %s771_s30, %s1060_s10  ;;  %p1066_p8 = scmp.lt.s32.totalorder %s1060_s10, %s1060_s10 }
 0x489   :  { %v646_v5 = vadd.f32 %v642_v3, %v636_v1  ;;  %v647_v6 = vadd.f32 %v645_v4, %v637_v2 }
 0x48a   :  { %p1067_p9 = por %p1066_p8, %p1065_p7 }
 0x48b   :  { %v650_v8 = vmul.f32 0.0078125, %v646_v5  ;;  %v651_v10 = vmul.f32 0.0078125, %v647_v6 }
 0x48c   :  { %p1068_p10 = pnand %p1067_p9, %p1061_p6 }
 0x48d   :  { %v654_v11 = vsub.f32 %v650_v8, %v652_v7  ;;  %v655_v12 = vsub.f32 %v651_v10, %v653_v9 }
 0x48f   :  { %v656_v13 = vadd.f32 1e-05, %v654_v11  ;;  %v657_v14 = vadd.f32 1e-05, %v655_v12 }
 0x491   :  { %924 = vrsqrt.f32 %v656_v13 }
 0x492   :  { %926 = vrsqrt.f32 %v657_v14 }
 0x49b   :  { %v925_v25 = vpop.eup %924 }
 0x49c   :  { %v927_v28 = vpop.eup %926  ;;  %v662_v29 = vmul.f32 %v925_v25, %v660_v15  ;;  %v686_v30 = vmul.f32 %v925_v25, %v684_v16  ;;  %v713_v58 = vmul.f32 %v925_v25, %v711_v19  ;;  %v740_v31 = vmul.f32 %v925_v25, %v738_v20 }
 0x49d   :  { %v663_v18 = vmul.f32 %v927_v28, %v661_v26  ;;  %v687_v32 = vmul.f32 %v927_v28, %v685_v27  ;;  %v714_v33 = vmul.f32 %v927_v28, %v712_v51  ;;  %v741_v35 = vmul.f32 %v927_v28, %v739_v52 }
 0x49e   :  { %v671_v37 = vmul.f32 %v809_v21, %v662_v29  ;;  %v696_v38 = vmul.f32 %v812_v22, %v686_v30  ;;  %v723_v39 = vmul.f32 %v816_v17, %v713_v58  ;;  %v750_v40 = vmul.f32 %v820_v23, %v740_v31 }
 0x49f   :  { %v672_v41 = vmul.f32 %v809_v21, %v663_v18  ;;  %v697_v42 = vmul.f32 %v812_v22, %v687_v32  ;;  %v724_v43 = vmul.f32 %v816_v17, %v714_v33  ;;  %v751_v44 = vmul.f32 %v820_v23, %v741_v35 }
 0x4a0   :  { %v680_v45 = vadd.f32 %v810_v57, %v671_v37  ;;  %v706_v46 = vadd.f32 %v814_v24, %v696_v38  ;;  %v733_v47 = vadd.f32 %v818_v34, %v723_v39  ;;  %v760_v48 = vadd.f32 %v822_v36, %v750_v40 }
 0x4a1   :  { %v681_v49 = vadd.f32 %v810_v57, %v672_v41  ;;  %v707_v50 = vadd.f32 %v814_v24, %v697_v42  ;;  %v734_v53 = vadd.f32 %v818_v34, %v724_v43  ;;  %v761_v54 = vadd.f32 %v822_v36, %v751_v44 }
 0x4a2   :  { %682 = vst.msk [vmem:[#allocation13] sm:$0xff] %vm213_vm2, %v680_v45  ;;  %709 = vst.msk [vmem:[#allocation13 + $0x10] sm:$0xff] %vm213_vm2, %v706_v46 }
 0x4a3   :  { %736 = vst.msk [vmem:[#allocation13 + $0x20] sm:$0xff] %vm213_vm2, %v733_v47  ;;  %763 = vst.msk [vmem:[#allocation13 + $0x30] sm:$0xff] %vm213_vm2, %v760_v48 }
 0x4a4   :  { %683 = vst.msk [vmem:[#allocation13 + $0x8] sm:$0xff] %vm213_vm2, %v681_v49  ;;  %710 = vst.msk [vmem:[#allocation13 + $0x18] sm:$0xff] %vm213_vm2, %v707_v50 }
 0x4a5   :  { %737 = vst.msk [vmem:[#allocation13 + $0x28] sm:$0xff] %vm213_vm2, %v734_v53  ;;  %764 = vst.msk [vmem:[#allocation13 + $0x38] sm:$0xff] %vm213_vm2, %v761_v54 }
 0x4a6   :  { %1071 = shalt.err (!%p1068_p10)
}
 0x4a7   :  { %s1072_s15 = scalar_lea.hbm %s1441_s11, 1024 }
 0x4a8   :  { %p1073_p11 = scmp.ne.s32.totalorder %s1441_s11, %s1072_s15  ;;  %p1076_p12 = scmp.lt.u32.totalorder %s1072_s15, %s1441_s11 }
 0x4aa   :  { %p1078_p13 = pnand %p1076_p12, %p1073_p11 }
 0x4ac   :  { %1081 = shalt.err (!%p1078_p13)
}
 0x4ad   :  { %776 = dma.vmem_to_hbm [thread:$0]  %s771_s30, 1024, %s1441_s11, [#allocation4], %s1100_s7, %s1100_s7, %s1101_s29  }
 0x4ae   :  { %1090 = dma.done.wait [#allocation4], 1024  }
 0x4af   :  { %1091 = vsyncadd [#allocation4], 4294966272 }
 0x4b0   :  { %780 = vsyncpa [#allocation3], 1 }
 0x4b1   :  { %781 = vsyncpa [#allocation6], 1 }
 0x4b2   :  { %782 = vsyncpa [#allocation9], 1 }
 0x4b3   :  { %783 = vsyncpa [#allocation12], 1 }
 0x4b4   :  { %784 = vsyncpa [#allocation4], 1 }

</bundles_post_ra>
